<compile_context>
chip_gen: v7x
topology: tpu7x:2x2x1
jax: 0.10.0
libtpu: 0.0.40
codegen_flags: <defaults>
</compile_context>

<pallas_src>
import math

import jax
import jax.numpy as jnp
from jax import lax
from jax.experimental import pallas as pl
from jax.experimental.pallas import tpu as pltpu


def _round_up(x: int, m: int) -> int:
    return ((x + m - 1) // m) * m


def _pick_tile(dim: int, target: int, align: int):
    """Pick a tile size <= target (aligned to `align`) and the padded extent."""
    padded = _round_up(dim, align)
    n_tiles = max(1, -(-padded // target))            # ceil(padded / target)
    tile = _round_up(-(-padded // n_tiles), align)    # ceil(padded / n_tiles), aligned
    padded = _round_up(padded, tile)
    return tile, padded


def _linear_kernel(x_ref, w_ref, o_ref, acc_ref):
    """One (tm, tn) output tile, accumulated over the K (d_in) grid axis."""
    # Zero the accumulator at the start of the K reduction.
    @pl.when(pl.program_id(2) == 0)
    def _():
        acc_ref[...] = jnp.zeros_like(acc_ref)

    # x tile: (tm, tk); weight tile: (tn, tk) in its native (d_out, d_in)
    # layout.  Contract on the shared tk (d_in) axis directly -> x @ W.T on
    # the MXU, f32 accumulation, no wrapper-side transpose needed.
    acc_ref[...] += lax.dot_general(
        x_ref[...],
        w_ref[...],
        dimension_numbers=(((1,), (1,)), ((), ())),
        preferred_element_type=jnp.float32,
    )

    # Write back on the last K step.
    @pl.when(pl.program_id(2) == pl.num_programs(2) - 1)
    def _():
        o_ref[...] = acc_ref[...].astype(o_ref.dtype)


@jax.jit
def linear_forward(x, weight):
    """x: (..., d_in), weight: (d_out, d_in) -> (..., d_out)."""
    d_out, d_in = weight.shape
    *lead, d_in_x = x.shape
    assert d_in_x == d_in

    # Flatten leading dims into M.
    m = 1
    for s in lead:
        m *= s
    x2 = x.reshape(m, d_in)

    # Tile targets: big, MXU-friendly (256-aligned where possible), sized to
    # comfortably fit the smallest scoped-VMEM budget across v5e/v6e/v7x
    # (< ~8 MiB of double-buffered tiles + accumulator).
    if x.dtype == jnp.bfloat16:
        t_tm, t_tn, t_tk = 512, 512, 1024
    else:
        t_tm, t_tn, t_tk = 256, 512, 512

    tm, m_pad = _pick_tile(m, t_tm, 8)
    tn, n_pad = _pick_tile(d_out, t_tn, 128)
    tk, k_pad = _pick_tile(d_in, t_tk, 128)

    # Zero-pad to tile-aligned extents (exact: padded K columns are zero in
    # both operands; padded M rows / N cols are sliced off afterwards).
    if (m_pad, k_pad) != (m, d_in):
        x2 = jnp.pad(x2, ((0, m_pad - m), (0, k_pad - d_in)))
    w = weight
    if (n_pad, k_pad) != (d_out, d_in):
        w = jnp.pad(w, ((0, n_pad - d_out), (0, k_pad - d_in)))

    out_dtype = x.dtype
    itemsize = jnp.dtype(out_dtype).itemsize
    cost = pl.CostEstimate(
        flops=2 * m * d_out * d_in,
        transcendentals=0,
        bytes_accessed=(
            m * d_in * jnp.dtype(x.dtype).itemsize
            + d_out * d_in * jnp.dtype(weight.dtype).itemsize
            + m * d_out * itemsize
        ),
    )

    out2 = pl.pallas_call(
        _linear_kernel,
        out_shape=jax.ShapeDtypeStruct((m_pad, n_pad), out_dtype),
        grid_spec=pltpu.PrefetchScalarGridSpec(
            num_scalar_prefetch=0,
            grid=(m_pad // tm, n_pad // tn, k_pad // tk),
            in_specs=[
                pl.BlockSpec((tm, tk), lambda i, j, k: (i, k)),  # x tile
                pl.BlockSpec((tn, tk), lambda i, j, k: (j, k)),  # W tile (native layout)
            ],
            out_specs=pl.BlockSpec((tm, tn), lambda i, j, k: (i, j)),
            scratch_shapes=[pltpu.VMEM((tm, tn), jnp.float32)],
        ),
        compiler_params=pltpu.CompilerParams(
            dimension_semantics=("parallel", "parallel", "arbitrary"),
        ),
        cost_estimate=cost,
    )(x2, w)

    out2 = out2[:m, :d_out]
    return out2.reshape(*lead, d_out)


def init_linear_weight(key, in_features, out_features, dtype=jnp.float32):
    """Matches nn.init.trunc_normal_(std=sqrt(2/(in+out)), a=-3std, b=3std)."""
    std = math.sqrt(2.0 / (in_features + out_features))
    w = jax.random.truncated_normal(
        key, lower=-3.0, upper=3.0, shape=(out_features, in_features)
    ) * std
    return w.astype(dtype)


if __name__ == "__main__":
    key = jax.random.PRNGKey(0)

    # --- Test 1: tile-aligned shapes, leading (batch, seq) dims ---
    k_w, k_x, key = jax.random.split(key, 3)
    in_features, out_features = 128, 256
    batch, seq = 4, 8
    weight = init_linear_weight(k_w, in_features, out_features, dtype=jnp.float32)
    x = jax.random.normal(k_x, (batch, seq, in_features), dtype=jnp.float32)

    y = jax.block_until_ready(linear_forward(x, weight))
    y_ref = jnp.einsum("oi,bsi->bso", weight, x)
    assert y.shape == (batch, seq, out_features)
    assert jnp.allclose(y, y_ref, atol=1e-4, rtol=1e-4)

    # --- Test 2: non-tile-aligned shapes exercise the pad + slice path ---
    k_w2, k_x2 = jax.random.split(key)
    in2, out2_f = 200, 300
    weight2 = init_linear_weight(k_w2, in2, out2_f, dtype=jnp.float32)
    x2 = jax.random.normal(k_x2, (3, 5, in2), dtype=jnp.float32)

    y2 = jax.block_until_ready(linear_forward(x2, weight2))
    y2_ref = jnp.einsum("oi,bsi->bso", weight2, x2)
    assert y2.shape == (3, 5, out2_f)
    assert jnp.allclose(y2, y2_ref, atol=1e-4, rtol=1e-4)

    print("KERNEL_OK")
</pallas_src>

<mosaic_0001>
module attributes {stable_mosaic.version = 11 : i64} {
  func.func @_linear_kernel(%arg0: i32, %arg1: i32, %arg2: i32, %arg3: memref<32x128xf32, #tpu.memory_space<vmem>>, %arg4: memref<256x128xf32, #tpu.memory_space<vmem>>, %arg5: memref<32x256xf32, #tpu.memory_space<vmem>>, %arg6: memref<32x256xf32, #tpu.memory_space<vmem>>) attributes {dimension_semantics = [#tpu.dimension_semantics<parallel>, #tpu.dimension_semantics<parallel>, #tpu.dimension_semantics<arbitrary>], iteration_bounds = array<i64: 1, 1, 1>, scalar_prefetch = 0 : i64, scratch_operands = 1 : i64, tpu.core_type = #tpu.core_type<tc>, window_params = [{transform_indices = @transform_0, window_bounds = array<i64: 32, 128>}, {transform_indices = @transform_1, window_bounds = array<i64: 256, 128>}, {transform_indices = @transform_2, window_bounds = array<i64: 32, 256>}]} {
    %c0_i32 = arith.constant 0 : i32
    %0 = arith.cmpi eq, %arg2, %c0_i32 : i32
    %1 = arith.extui %0 : i1 to i32
    %c0_i32_0 = arith.constant 0 : i32
    %2 = arith.cmpi ne, %1, %c0_i32_0 : i32
    scf.if %2 {
      %cst_10 = arith.constant 0.000000e+00 : f32
      %12 = vector.broadcast %cst_10 : f32 to vector<32x256xf32>
      %c0_11 = arith.constant 0 : index
      %c0_12 = arith.constant 0 : index
      %13 = vector.load %arg6[%c0_11, %c0_12] : memref<32x256xf32, #tpu.memory_space<vmem>>, vector<32x256xf32>
      tpu.vector_store %arg6[%c0_11, %c0_12], %12 {strides = array<i32>} : memref<32x256xf32, #tpu.memory_space<vmem>>, vector<32x256xf32>,
    } else {
    }
    %c0 = arith.constant 0 : index
    %c0_1 = arith.constant 0 : index
    %3 = vector.load %arg6[%c0, %c0_1] : memref<32x256xf32, #tpu.memory_space<vmem>>, vector<32x256xf32>
    %c0_2 = arith.constant 0 : index
    %c0_3 = arith.constant 0 : index
    %4 = vector.load %arg3[%c0_2, %c0_3] : memref<32x128xf32, #tpu.memory_space<vmem>>, vector<32x128xf32>
    %c0_4 = arith.constant 0 : index
    %c0_5 = arith.constant 0 : index
    %5 = vector.load %arg4[%c0_4, %c0_5] : memref<256x128xf32, #tpu.memory_space<vmem>>, vector<256x128xf32>
    %cst = arith.constant dense<0.000000e+00> : vector<32x256xf32>
    %6 = tpu.matmul %4, %5, %cst {dimension_numbers = #tpu.dot_dimension_numbers<[1], [1], [0], [0], [0, 0, 1, 0], [], []>} : vector<32x128xf32>, vector<256x128xf32>, vector<32x256xf32> -> vector<32x256xf32>
    %7 = arith.addf %3, %6 : vector<32x256xf32>
    %c0_6 = arith.constant 0 : index
    %c0_7 = arith.constant 0 : index
    %8 = vector.load %arg6[%c0_6, %c0_7] : memref<32x256xf32, #tpu.memory_space<vmem>>, vector<32x256xf32>
    tpu.vector_store %arg6[%c0_6, %c0_7], %7 {strides = array<i32>} : memref<32x256xf32, #tpu.memory_space<vmem>>, vector<32x256xf32>,
    %c0_i32_8 = arith.constant 0 : i32
    %9 = arith.cmpi eq, %arg2, %c0_i32_8 : i32
    %10 = arith.extui %9 : i1 to i32
    %c0_i32_9 = arith.constant 0 : i32
    %11 = arith.cmpi ne, %10, %c0_i32_9 : i32
    scf.if %11 {
      %c0_10 = arith.constant 0 : index
      %c0_11 = arith.constant 0 : index
      %12 = vector.load %arg6[%c0_10, %c0_11] : memref<32x256xf32, #tpu.memory_space<vmem>>, vector<32x256xf32>
      %c0_12 = arith.constant 0 : index
      %c0_13 = arith.constant 0 : index
      %13 = vector.load %arg5[%c0_12, %c0_13] : memref<32x256xf32, #tpu.memory_space<vmem>>, vector<32x256xf32>
      tpu.vector_store %arg5[%c0_12, %c0_13], %12 {strides = array<i32>} : memref<32x256xf32, #tpu.memory_space<vmem>>, vector<32x256xf32>,
    } else {
    }
    return
  }
  func.func @transform_0(%arg0: i32, %arg1: i32, %arg2: i32) -> (i32, i32) {
    %c0_i32 = arith.constant 0 : i32
    return %arg0, %arg2 : i32, i32
  }
  func.func @transform_1(%arg0: i32, %arg1: i32, %arg2: i32) -> (i32, i32) {
    %c0_i32 = arith.constant 0 : i32
    return %arg1, %arg2 : i32, i32
  }
  func.func @transform_2(%arg0: i32, %arg1: i32, %arg2: i32) -> (i32, i32) {
    %c0_i32 = arith.constant 0 : i32
    return %arg0, %arg1 : i32, i32
  }
}

</mosaic_0001>

<bundles_post_ra>
// kernel: linear_forward.1
= control target key start
LH: loop header
LB: loop body
LE: loop exit
PB: predicated region body
PF: predicated region fallthrough
CT: control target
= control target key end

     0   :  { %7 = vsyncpa [#allocation4], 0  ;;  %s471_s0 = inlined_call_operand.hbm [shape: f32[32,128], index: 0, kind: input, shape index: {}]   ;;  %s472_s1 = inlined_call_operand.hbm [shape: f32[256,128], index: 1, kind: input, shape index: {}]   ;;  %s473_s2 = inlined_call_operand.hbm [shape: f32[32,256], index: 2, kind: output, shape index: {}]  }
   0x1   :  { %8 = vsyncpa [#allocation7], 0 }
   0x2   :  { %9 = vsyncpa [#allocation5], 0  ;;  %s405_s9 = smov [#allocation3]   ;;  %s333_s13 = scalar_lea.hbm %s471_s0, 512 }
   0x3   :  { %s15_s10 = sshll.u32 %s405_s9, 4  ;;  %p334_p0 = scmp.ne.s32.totalorder %s471_s0, %s333_s13  ;;  %s16_s10 = int_to_ptr.vmem [resolvable:$true] %s15_s10 }
   0x4   :  { %p337_p1 = scmp.lt.u32.totalorder %s333_s13, %s471_s0 }
   0x6   :  { %p339_p2 = pnand %p337_p1, %p334_p0 }
   0x8   :  { %342 = shalt.err (!%p339_p2)
}
   0x9   :  { %s343_s18 = scalar_lea.vmem %s16_s10, 512  ;;  %p348_p4 = scmp.lt.s32.totalorder %s16_s10, %s16_s10 }
   0xa   :  { %p344_p3 = scmp.ne.s32.totalorder %s16_s10, %s343_s18  ;;  %p349_p5 = scmp.lt.s32.totalorder %s343_s18, %s343_s18 }
   0xc   :  { %p350_p6 = por %p349_p5, %p348_p4 }
   0xe   :  { %p351_p7 = pnand %p350_p6, %p344_p3 }
  0x10   :  { %354 = shalt.err (!%p351_p7)
}
  0x11   :  { %s406_s19 = smov 128   ;;  %s407_s20 = smov 8  }
  0x12   :  { %21 = dma.hbm_to_vmem [thread:$0]  %s471_s0, 512, %s16_s10, [#allocation4], %s406_s19, %s406_s19, %s407_s20  }
  0x13   :  { %s408_s23 = smov [#allocation6]   ;;  %s355_s27 = scalar_lea.hbm %s472_s1, 4096 }
  0x14   :  { %s27_s24 = sshll.u32 %s408_s23, 4  ;;  %p356_p8 = scmp.ne.s32.totalorder %s472_s1, %s355_s27  ;;  %s28_s24 = int_to_ptr.vmem [resolvable:$true] %s27_s24 }
  0x15   :  { %p359_p9 = scmp.lt.u32.totalorder %s355_s27, %s472_s1 }
  0x17   :  { %p361_p10 = pnand %p359_p9, %p356_p8 }
  0x19   :  { %364 = shalt.err (!%p361_p10)
}
  0x1a   :  { %s365_s4 = scalar_lea.vmem %s28_s24, 4096  ;;  %p370_p12 = scmp.lt.s32.totalorder %s28_s24, %s28_s24 }
  0x1b   :  { %p366_p11 = scmp.ne.s32.totalorder %s28_s24, %s365_s4  ;;  %p371_p13 = scmp.lt.s32.totalorder %s365_s4, %s365_s4 }
  0x1d   :  { %p372_p0 = por %p371_p13, %p370_p12 }
  0x1f   :  { %p373_p1 = pnand %p372_p0, %p366_p11 }
  0x21   :  { %376 = shalt.err (!%p373_p1)
}
  0x22   :  { %33 = dma.hbm_to_vmem [thread:$0]  %s472_s1, 4096, %s28_s24, [#allocation7], %s406_s19, %s406_s19, %s407_s20  }
  0x23   :  { %399 = dma.done.wait [#allocation4], 512  }
  0x24   :  { %400 = vsyncadd [#allocation4], 4294966784 }
  0x25   :  { %401 = dma.done.wait [#allocation7], 4096  }
  0x26   :  { %402 = vsyncadd [#allocation7], 4294963200  ;;  %v80_v0 = vld [vmem:[#allocation6 + $0x80] sm:$0xff]  ;;  %v81_v1 = vld [vmem:[#allocation6 + $0x88] sm:$0xff]  ;;  %s409_s1 = smov [#allocation8]  }
  0x27   :  { %v64_v2 = vld [vmem:[#allocation6] sm:$0xff]  ;;  %v278_v3 = vpack.c.bf16 %v81_v1, %v80_v0  ;;  %v65_v4 = vld [vmem:[#allocation6 + $0x8] sm:$0xff]  ;;  %v82_v5 = vld [vmem:[#allocation6 + $0x90] sm:$0xff]  ;;  %s225_s6 = sshll.u32 %s409_s1, 4  ;;  %s226_s6 = int_to_ptr.vmem [resolvable:$true] %s225_s6 }
  0x28   :  { %v83_v6 = vld [vmem:[#allocation6 + $0x98] sm:$0xff]  ;;  %v280_v7 = vpack.c.bf16 %v65_v4, %v64_v2  ;;  %v66_v9 = vld [vmem:[#allocation6 + $0x10] sm:$0xff]  ;;  %v84_v11 = vld [vmem:[#allocation6 + $0xa0] sm:$0xff]  ;;  %s377_s7 = scalar_lea.vmem %s226_s6, 1024  ;;  %p382_p3 = scmp.lt.s32.totalorder %s226_s6, %s226_s6 }
  0x29   :  { %v282_v8 = vpack.c.bf16 %v83_v6, %v82_v5  ;;  %279 = vmatprep.subr.bf16.mxu0 %v278_v3  ;;  %310 = vmatprep.subr.bf16.mxu1 %v278_v3  ;;  %v67_v10 = vld [vmem:[#allocation6 + $0x18] sm:$0xff]  ;;  %v85_v12 = vld [vmem:[#allocation6 + $0xa8] sm:$0xff]  ;;  %v451_v15 = vld [vmem:[#allocation3] sm:$0xff]  ;;  %p378_p2 = scmp.ne.s32.totalorder %s226_s6, %s377_s7  ;;  %p383_p4 = scmp.lt.s32.totalorder %s377_s7, %s377_s7 }
  0x2a   :  { %281 = vmatpush3.bf16.xpose.msra.mxu0 %v280_v7  ;;  %318 = vmatpush3.bf16.xpose.msra.mxu1 %v280_v7  ;;  %v284_v13 = vpack.c.bf16 %v67_v10, %v66_v9  ;;  %v286_v14 = vpack.c.bf16 %v85_v12, %v84_v11  ;;  %v454_v16 = vld [vmem:[#allocation3 + $0x10] sm:$0xff]  ;;  %v68_v17 = vld [vmem:[#allocation6 + $0x20] sm:$0xff]  ;;  %v69_v18 = vld [vmem:[#allocation6 + $0x28] sm:$0xff] }
  0x2b   :  { %283 = vmatprep.subr.bf16.mxu0 %v282_v8  ;;  %311 = vmatprep.subr.bf16.mxu1 %v282_v8  ;;  %v86_v19 = vld [vmem:[#allocation6 + $0xb0] sm:$0xff]  ;;  %v87_v20 = vld [vmem:[#allocation6 + $0xb8] sm:$0xff]  ;;  %v288_v21 = vpack.c.bf16 %v69_v18, %v68_v17  ;;  %v88_v25 = vld [vmem:[#allocation6 + $0xc0] sm:$0xff]  ;;  %p384_p5 = por %p383_p4, %p382_p3 }
  0x2c   :  { %270 = vmatprep.mubr.f32.mxu0 %v451_v15  ;;  %274 = vmatprep.mubr.f32.mxu1 %v454_v16  ;;  %v290_v22 = vpack.c.bf16 %v87_v20, %v86_v19  ;;  %v70_v23 = vld [vmem:[#allocation6 + $0x30] sm:$0xff]  ;;  %v71_v24 = vld [vmem:[#allocation6 + $0x38] sm:$0xff]  ;;  %v89_v26 = vld [vmem:[#allocation6 + $0xc8] sm:$0xff] }
  0x2d   :  { %v292_v27 = vpack.c.bf16 %v71_v24, %v70_v23  ;;  %v294_v28 = vpack.c.bf16 %v89_v26, %v88_v25  ;;  %v72_v29 = vld [vmem:[#allocation6 + $0x40] sm:$0xff]  ;;  %v73_v30 = vld [vmem:[#allocation6 + $0x48] sm:$0xff]  ;;  %v90_v31 = vld [vmem:[#allocation6 + $0xd0] sm:$0xff]  ;;  %p385_p6 = pnand %p384_p5, %p378_p2 }
  0x2e   :  { %v91_v32 = vld [vmem:[#allocation6 + $0xd8] sm:$0xff]  ;;  %v296_v33 = vpack.c.bf16 %v73_v30, %v72_v29  ;;  %v74_v35 = vld [vmem:[#allocation6 + $0x50] sm:$0xff]  ;;  %v92_v37 = vld [vmem:[#allocation6 + $0xe0] sm:$0xff] }
  0x2f   :  { %v298_v34 = vpack.c.bf16 %v91_v32, %v90_v31  ;;  %v75_v36 = vld [vmem:[#allocation6 + $0x58] sm:$0xff]  ;;  %v93_v38 = vld [vmem:[#allocation6 + $0xe8] sm:$0xff]  ;;  %v76_v41 = vld [vmem:[#allocation6 + $0x60] sm:$0xff] }
  0x30   :  { %v300_v39 = vpack.c.bf16 %v75_v36, %v74_v35  ;;  %v302_v40 = vpack.c.bf16 %v93_v38, %v92_v37  ;;  %v77_v42 = vld [vmem:[#allocation6 + $0x68] sm:$0xff]  ;;  %v94_v43 = vld [vmem:[#allocation6 + $0xf0] sm:$0xff]  ;;  %v95_v44 = vld [vmem:[#allocation6 + $0xf8] sm:$0xff] }
  0x31   :  { %v304_v45 = vpack.c.bf16 %v77_v42, %v76_v41  ;;  %v306_v46 = vpack.c.bf16 %v95_v44, %v94_v43  ;;  %v78_v47 = vld [vmem:[#allocation6 + $0x70] sm:$0xff]  ;;  %v79_v48 = vld [vmem:[#allocation6 + $0x78] sm:$0xff]  ;;  %v61_v50 = vld [vmem:[#allocation3 + $0x8] sm:$0xff] }
  0x32   :  { %285 = vmatpush3.bf16.xpose.msra.mxu0 %v284_v13  ;;  %319 = vmatpush3.bf16.xpose.msra.mxu1 %v284_v13  ;;  %v308_v49 = vpack.c.bf16 %v79_v48, %v78_v47  ;;  %v63_v51 = vld [vmem:[#allocation3 + $0x18] sm:$0xff] }
  0x33   :  { %287 = vmatprep.subr.bf16.mxu0 %v286_v14  ;;  %312 = vmatprep.subr.bf16.mxu1 %v286_v14 }
  0x3a   :  { %289 = vmatpush3.bf16.xpose.msra.mxu0 %v288_v21  ;;  %320 = vmatpush3.bf16.xpose.msra.mxu1 %v288_v21 }
  0x3b   :  { %291 = vmatprep.subr.bf16.mxu0 %v290_v22  ;;  %313 = vmatprep.subr.bf16.mxu1 %v290_v22 }
  0x42   :  { %293 = vmatpush3.bf16.xpose.msra.mxu0 %v292_v27  ;;  %321 = vmatpush3.bf16.xpose.msra.mxu1 %v292_v27 }
  0x43   :  { %295 = vmatprep.subr.bf16.mxu0 %v294_v28  ;;  %314 = vmatprep.subr.bf16.mxu1 %v294_v28 }
  0x4a   :  { %297 = vmatpush3.bf16.xpose.msra.mxu0 %v296_v33  ;;  %322 = vmatpush3.bf16.xpose.msra.mxu1 %v296_v33 }
  0x4b   :  { %299 = vmatprep.subr.bf16.mxu0 %v298_v34  ;;  %315 = vmatprep.subr.bf16.mxu1 %v298_v34 }
  0x52   :  { %301 = vmatpush3.bf16.xpose.msra.mxu0 %v300_v39  ;;  %323 = vmatpush3.bf16.xpose.msra.mxu1 %v300_v39 }
  0x53   :  { %303 = vmatprep.subr.bf16.mxu0 %v302_v40  ;;  %316 = vmatprep.subr.bf16.mxu1 %v302_v40 }
  0x5a   :  { %305 = vmatpush3.bf16.xpose.msra.mxu0 %v304_v45  ;;  %324 = vmatpush3.bf16.xpose.msra.mxu1 %v304_v45 }
  0x5b   :  { %307 = vmatprep.subr.bf16.mxu0 %v306_v46  ;;  %317 = vmatprep.subr.bf16.mxu1 %v306_v46 }
  0x62   :  { %309 = vmatpush3.bf16.xpose.msra.mxu0 %v308_v49  ;;  %325 = vmatpush3.bf16.xpose.msra.mxu1 %v308_v49 }
  0x69   :  { %271 = vmatmul.mubr.f32.vlgmr.msra.gmra.mrb[0].mxu0 %v451_v15  ;;  %275 = vmatmul.mubr.f32.vlgmr.msra.gmra.mrb[0].mxu1 %v454_v16 }
  0x6a   :  { %272 = vmatprep.mubr.f32.mxu0 %v61_v50  ;;  %276 = vmatprep.mubr.f32.mxu1 %v63_v51 }
  0x6d   :  { %273 = vmatmul.mubr.f32.gmra.mrb[2].mxu0 %v61_v50  ;;  %277 = vmatmul.mubr.f32.gmra.mrb[2].mxu1 %v63_v51 }
 0x13c   :  { %v162_v52 = vpop.f32.mrb[0].mxu0  ;;  %v174_v53 = vpop.f32.mrb[0].mxu1 }
 0x13d   :  { %212 = vst [vmem:[#allocation8] sm:$0xff] %v162_v52  ;;  %216 = vst [vmem:[#allocation8 + $0x20] sm:$0xff] %v174_v53  ;;  %v164_v54 = vpop.f32.mrb[1].mxu0  ;;  %v176_v55 = vpop.f32.mrb[1].mxu1 }
 0x13e   :  { %213 = vst [vmem:[#allocation8 + $0x8] sm:$0xff] %v164_v54  ;;  %217 = vst [vmem:[#allocation8 + $0x28] sm:$0xff] %v176_v55 }
 0x140   :  { %v168_v56 = vpop.f32.mrb[2].mxu0  ;;  %v180_v57 = vpop.f32.mrb[2].mxu1 }
 0x141   :  { %214 = vst [vmem:[#allocation8 + $0x10] sm:$0xff] %v168_v56  ;;  %218 = vst [vmem:[#allocation8 + $0x30] sm:$0xff] %v180_v57  ;;  %v170_v58 = vpop.f32.mrb[3].mxu0  ;;  %v182_v59 = vpop.f32.mrb[3].mxu1 }
 0x142   :  { %215 = vst [vmem:[#allocation8 + $0x18] sm:$0xff] %v170_v58  ;;  %219 = vst [vmem:[#allocation8 + $0x38] sm:$0xff] %v182_v59 }
 0x143   :  { %388 = shalt.err (!%p385_p6)
}
 0x144   :  { %s389_s10 = scalar_lea.hbm %s473_s2, 1024 }
 0x145   :  { %p390_p7 = scmp.ne.s32.totalorder %s473_s2, %s389_s10  ;;  %p393_p8 = scmp.lt.u32.totalorder %s389_s10, %s473_s2 }
 0x147   :  { %p395_p9 = pnand %p393_p8, %p390_p7 }
 0x149   :  { %398 = shalt.err (!%p395_p9)
}
 0x14a   :  { %s410_s15 = smov 256   ;;  %s411_s16 = smov 16  }
 0x14b   :  { %231 = dma.vmem_to_hbm [thread:$0]  %s226_s6, 1024, %s473_s2, [#allocation5], %s410_s15, %s410_s15, %s411_s16  }
 0x14c   :  { %403 = dma.done.wait [#allocation5], 1024  }
 0x14d   :  { %404 = vsyncadd [#allocation5], 4294966272 }
 0x14e   :  { %235 = vsyncpa [#allocation4], 1 }
 0x14f   :  { %236 = vsyncpa [#allocation7], 1 }
 0x150   :  { %237 = vsyncpa [#allocation5], 1 }

</bundles_post_ra>
